<compile_context>
chip_gen: v7x
topology: tpu7x:2x2x1
jax: 0.10.0
libtpu: 0.0.40
codegen_flags: <defaults>
</compile_context>

<pallas_src>
import functools

import jax
import jax.numpy as jnp
from jax.experimental import pallas as pl
from jax.experimental.pallas import tpu as pltpu


def _mlp_kernel(x_ref, w1_ref, b1_ref, w2_ref, b2_ref, w3_ref, b3_ref, o_ref):
    cdt = w1_ref.dtype  # matmul-input (data-movement) dtype: f32 or bf16

    x = x_ref[...]  # (block_b, in_dim), already in compute dtype

    # fc1 + ReLU (MXU, f32 accumulation; elementwise epilogue in f32)
    h1 = jnp.dot(x, w1_ref[...], preferred_element_type=jnp.float32)
    h1 = jnp.maximum(h1 + b1_ref[...], 0.0)
    # dropout -> identity (inference mode)

    # fc2 + ReLU
    h2 = jnp.dot(h1.astype(cdt), w2_ref[...], preferred_element_type=jnp.float32)
    h2 = jnp.maximum(h2 + b2_ref[...], 0.0)
    # dropout -> identity (inference mode)

    # fc3 + sigmoid, lane-dense: contract w3 (1, hid) with h2 (block_b, hid)
    # along the hidden axis -> (1, block_b), batch on the lane axis.
    logit = jax.lax.dot_general(
        w3_ref[...], h2.astype(cdt),
        dimension_numbers=(((1,), (1,)), ((), ())),
        preferred_element_type=jnp.float32,
    ) + b3_ref[0]
    o_ref[...] = jax.nn.sigmoid(logit).astype(o_ref.dtype)


def _padded_bytes(rows, cols, itemsize):
    """Rough VMEM bytes of a (rows, cols) tile after (8, 128) tiling."""
    return (-(-rows // 8) * 8) * (-(-cols // 128) * 128) * itemsize


def state_predictor_forward(x, params, *, block_b=512, compute_dtype=jnp.float32):
    """x: (B, input_size). params: w1 (in,hid), b1 (1,hid), w2 (hid,hid),
    b2 (1,hid), w3 (1,hid), b3 (1,). Returns (B, 1) float32 probabilities."""
    B, in_dim = x.shape
    hid = params["w1"].shape[1]
    wbytes = jnp.dtype(compute_dtype).itemsize

    if block_b % 128 != 0:
        raise ValueError("block_b must be a multiple of 128 (lane-dense output tile)")

    # --- explicit VMEM budget: single-buffered resident weights +
    #     double-buffered streamed x tiles + double-buffered output rows -------
    def footprint(bb):
        weights = (_padded_bytes(in_dim, hid, wbytes)
                   + _padded_bytes(hid, hid, wbytes)
                   + _padded_bytes(1, hid, wbytes)
                   + 2 * _padded_bytes(1, hid, 4))
        stream = 2 * _padded_bytes(bb, in_dim, wbytes) + 2 * _padded_bytes(1, bb, 4)
        return weights + stream

    vmem_target = 40 * 1024 * 1024  # leave headroom on v7x's 64 MiB VMEM
    while block_b > 128 and footprint(block_b) > vmem_target:
        block_b -= 128
    vmem_limit = int(min(56 * 1024 * 1024, max(32 * 1024 * 1024, 2 * footprint(block_b))))

    # --- pad batch so every grid step sees a full, aligned tile ---------------
    n_tiles = pl.cdiv(B, block_b)
    b_pad = n_tiles * block_b
    if b_pad != B:
        x = jnp.pad(x, ((0, b_pad - B), (0, 0)))

    # bf16 (or f32) data movement for x / weights; biases stay f32 so the
    # post-matmul elementwise math runs in f32 on every chip generation.
    x = x.astype(compute_dtype)
    w1 = params["w1"].astype(compute_dtype)
    w2 = params["w2"].astype(compute_dtype)
    w3 = params["w3"].astype(compute_dtype)
    b1 = params["b1"].astype(jnp.float32)
    b2 = params["b2"].astype(jnp.float32)
    b3 = params["b3"].astype(jnp.float32)

    # grid-invariant inputs: single-buffered residents
    resident = functools.partial(pl.BlockSpec, pipeline_mode=pl.Buffered(1))

    out = pl.pallas_call(
        _mlp_kernel,
        out_shape=jax.ShapeDtypeStruct((1, b_pad), jnp.float32),
        grid_spec=pltpu.PrefetchScalarGridSpec(
            num_scalar_prefetch=0,
            grid=(n_tiles,),
            in_specs=[
                # streamed batch tile (double-buffered / pipelined by default)
                pl.BlockSpec((block_b, in_dim), lambda i: (i, 0)),
                resident((in_dim, hid), lambda i: (0, 0)),   # w1
                resident((1, hid), lambda i: (0, 0)),        # b1
                resident((hid, hid), lambda i: (0, 0)),      # w2
                resident((1, hid), lambda i: (0, 0)),        # b2
                resident((1, hid), lambda i: (0, 0)),        # w3 row
                # scalar fc3 bias in SMEM
                pl.BlockSpec(memory_space=pltpu.MemorySpace.SMEM),
            ],
            out_specs=pl.BlockSpec((1, block_b), lambda i: (0, i)),
        ),
        compiler_params=pltpu.CompilerParams(
            dimension_semantics=("parallel",),
            vmem_limit_bytes=vmem_limit,
        ),
    )(x, w1, b1, w2, b2, w3, b3)

    # lane-dense (1, b_pad) row -> (B, 1) column expected by the module API
    return out[0, :B].reshape(B, 1)


def init_params(key, input_size, hidden_size):
    """Deterministic synthetic parameters (PyTorch shapes; fc1/fc2 stored as W.T)."""
    k1, k2, k3, k4, k5, k6 = jax.random.split(key, 6)
    w1 = jax.random.normal(k1, (input_size, hidden_size), jnp.float32) * 0.1
    b1 = jax.random.normal(k2, (1, hidden_size), jnp.float32) * 0.1
    w2 = jax.random.normal(k3, (hidden_size, hidden_size), jnp.float32) * 0.1
    b2 = jax.random.normal(k4, (1, hidden_size), jnp.float32) * 0.1
    # fc3: PyTorch nn.Linear(hidden, 1).weight already has shape (1, hidden).
    w3 = jax.random.normal(k5, (1, hidden_size), jnp.float32) * 0.1
    b3 = jax.random.normal(k6, (1,), jnp.float32) * 0.1
    return dict(w1=w1, b1=b1, w2=w2, b2=b2, w3=w3, b3=b3)


def _reference_forward(x, p):
    h1 = jnp.maximum(x @ p["w1"] + p["b1"], 0.0)
    h2 = jnp.maximum(h1 @ p["w2"] + p["b2"], 0.0)
    return jax.nn.sigmoid(h2 @ p["w3"].T + p["b3"])


if __name__ == "__main__":
    key = jax.random.PRNGKey(0)
    kx, kp = jax.random.split(key)

    batch = 300        # deliberately not a tile multiple -> exercises padding/masking
    input_size = 16
    hidden_size = 32

    x = jax.random.normal(kx, (batch, input_size), jnp.float32)
    params = init_params(kp, input_size, hidden_size)
    ref = _reference_forward(x, params)

    # f32 path (tight check); block_b=128 -> 3 grid steps even at this toy batch.
    out = jax.block_until_ready(
        state_predictor_forward(x, params, block_b=128, compute_dtype=jnp.float32))
    assert out.shape == (batch, 1), out.shape
    assert jnp.allclose(out, ref, atol=1e-4, rtol=1e-4), "f32 kernel mismatch vs reference"

    # bf16 data-movement path (memory-roofline win on v5e/v6e/v7x); looser tolerance.
    out_bf16 = jax.block_until_ready(
        state_predictor_forward(x, params, block_b=128, compute_dtype=jnp.bfloat16))
    assert out_bf16.shape == (batch, 1), out_bf16.shape
    assert jnp.allclose(out_bf16, ref, atol=5e-2, rtol=0.0), "bf16 kernel mismatch vs reference"

    print("KERNEL_OK")
</pallas_src>

<mosaic_0001>
module attributes {stable_mosaic.version = 11 : i64} {
  func.func @_mlp_kernel(%arg0: i32, %arg1: memref<128x16xf32, #tpu.memory_space<vmem>>, %arg2: memref<16x32xf32, #tpu.memory_space<vmem>>, %arg3: memref<1x32xf32, #tpu.memory_space<vmem>>, %arg4: memref<32x32xf32, #tpu.memory_space<vmem>>, %arg5: memref<1x32xf32, #tpu.memory_space<vmem>>, %arg6: memref<1x32xf32, #tpu.memory_space<vmem>>, %arg7: memref<1xf32, #tpu.memory_space<smem>>, %arg8: memref<1x128xf32, #tpu.memory_space<vmem>>) attributes {dimension_semantics = [#tpu.dimension_semantics<parallel>], iteration_bounds = array<i64: 3>, scalar_prefetch = 0 : i64, scratch_operands = 0 : i64, tpu.core_type = #tpu.core_type<tc>, window_params = [{transform_indices = @transform_0, window_bounds = array<i64: 128, 16>}, {pipeline_mode = #tpu.pipeline_mode<synchronous>, transform_indices = @transform_1, window_bounds = array<i64: 16, 32>}, {pipeline_mode = #tpu.pipeline_mode<synchronous>, transform_indices = @transform_2, window_bounds = array<i64: 1, 32>}, {pipeline_mode = #tpu.pipeline_mode<synchronous>, transform_indices = @transform_3, window_bounds = array<i64: 32, 32>}, {pipeline_mode = #tpu.pipeline_mode<synchronous>, transform_indices = @transform_4, window_bounds = array<i64: 1, 32>}, {pipeline_mode = #tpu.pipeline_mode<synchronous>, transform_indices = @transform_5, window_bounds = array<i64: 1, 32>}, {transform_indices = @transform_6, window_bounds = array<i64: 1>}, {transform_indices = @transform_7, window_bounds = array<i64: 1, 128>}]} {
    %c0 = arith.constant 0 : index
    %c0_0 = arith.constant 0 : index
    %0 = vector.load %arg1[%c0, %c0_0] : memref<128x16xf32, #tpu.memory_space<vmem>>, vector<128x16xf32>
    %c0_1 = arith.constant 0 : index
    %c0_2 = arith.constant 0 : index
    %1 = vector.load %arg2[%c0_1, %c0_2] : memref<16x32xf32, #tpu.memory_space<vmem>>, vector<16x32xf32>
    %cst = arith.constant dense<0.000000e+00> : vector<128x32xf32>
    %2 = tpu.matmul %0, %1, %cst {dimension_numbers = #tpu.dot_dimension_numbers<[1], [0], [0], [1], [0, 0, 1, 1], [], []>} : vector<128x16xf32>, vector<16x32xf32>, vector<128x32xf32> -> vector<128x32xf32>
    %c0_3 = arith.constant 0 : index
    %c0_4 = arith.constant 0 : index
    %3 = vector.load %arg3[%c0_3, %c0_4] : memref<1x32xf32, #tpu.memory_space<vmem>>, vector<1x32xf32>
    %4 = vector.broadcast %3 : vector<1x32xf32> to vector<128x32xf32>
    %5 = arith.addf %2, %4 : vector<128x32xf32>
    %cst_5 = arith.constant 0.000000e+00 : f32
    %6 = vector.broadcast %cst_5 : f32 to vector<128x32xf32>
    %7 = arith.maximumf %5, %6 : vector<128x32xf32>
    %c0_6 = arith.constant 0 : index
    %c0_7 = arith.constant 0 : index
    %8 = vector.load %arg4[%c0_6, %c0_7] : memref<32x32xf32, #tpu.memory_space<vmem>>, vector<32x32xf32>
    %cst_8 = arith.constant dense<0.000000e+00> : vector<128x32xf32>
    %9 = tpu.matmul %7, %8, %cst_8 {dimension_numbers = #tpu.dot_dimension_numbers<[1], [0], [0], [1], [0, 0, 1, 1], [], []>} : vector<128x32xf32>, vector<32x32xf32>, vector<128x32xf32> -> vector<128x32xf32>
    %c0_9 = arith.constant 0 : index
    %c0_10 = arith.constant 0 : index
    %10 = vector.load %arg5[%c0_9, %c0_10] : memref<1x32xf32, #tpu.memory_space<vmem>>, vector<1x32xf32>
    %11 = vector.broadcast %10 : vector<1x32xf32> to vector<128x32xf32>
    %12 = arith.addf %9, %11 : vector<128x32xf32>
    %cst_11 = arith.constant 0.000000e+00 : f32
    %13 = vector.broadcast %cst_11 : f32 to vector<128x32xf32>
    %14 = arith.maximumf %12, %13 : vector<128x32xf32>
    %c0_12 = arith.constant 0 : index
    %c0_13 = arith.constant 0 : index
    %15 = vector.load %arg6[%c0_12, %c0_13] : memref<1x32xf32, #tpu.memory_space<vmem>>, vector<1x32xf32>
    %cst_14 = arith.constant dense<0.000000e+00> : vector<1x128xf32>
    %16 = tpu.matmul %15, %14, %cst_14 {dimension_numbers = #tpu.dot_dimension_numbers<[1], [1], [0], [0], [0, 0, 1, 0], [], []>} : vector<1x32xf32>, vector<128x32xf32>, vector<1x128xf32> -> vector<1x128xf32>
    %c0_15 = arith.constant 0 : index
    %17 = memref.load %arg7[%c0_15] : memref<1xf32, #tpu.memory_space<smem>>
    %18 = vector.broadcast %17 : f32 to vector<1x128xf32>
    %19 = arith.addf %16, %18 : vector<1x128xf32>
    %20 = arith.negf %19 : vector<1x128xf32>
    %21 = math.exp %20 : vector<1x128xf32>
    %cst_16 = arith.constant 1.000000e+00 : f32
    %22 = vector.broadcast %cst_16 : f32 to vector<1x128xf32>
    %23 = arith.addf %22, %21 : vector<1x128xf32>
    %24 = arith.divf %22, %23 : vector<1x128xf32>
    %c0_17 = arith.constant 0 : index
    %c0_18 = arith.constant 0 : index
    %25 = vector.load %arg8[%c0_17, %c0_18] : memref<1x128xf32, #tpu.memory_space<vmem>>, vector<1x128xf32>
    tpu.vector_store %arg8[%c0_17, %c0_18], %24 {strides = array<i32>} : memref<1x128xf32, #tpu.memory_space<vmem>>, vector<1x128xf32>,
    return
  }
  func.func @transform_0(%arg0: i32) -> (i32, i32) {
    %c0_i32 = arith.constant 0 : i32
    %c0_i32_0 = arith.constant 0 : i32
    return %arg0, %c0_i32 : i32, i32
  }
  func.func @transform_1(%arg0: i32) -> (i32, i32) {
    %c0_i32 = arith.constant 0 : i32
    %c0_i32_0 = arith.constant 0 : i32
    %c0_i32_1 = arith.constant 0 : i32
    return %c0_i32, %c0_i32_0 : i32, i32
  }
  func.func @transform_2(%arg0: i32) -> (i32, i32) {
    %c0_i32 = arith.constant 0 : i32
    %c0_i32_0 = arith.constant 0 : i32
    %c0_i32_1 = arith.constant 0 : i32
    return %c0_i32, %c0_i32_0 : i32, i32
  }
  func.func @transform_3(%arg0: i32) -> (i32, i32) {
    %c0_i32 = arith.constant 0 : i32
    %c0_i32_0 = arith.constant 0 : i32
    %c0_i32_1 = arith.constant 0 : i32
    return %c0_i32, %c0_i32_0 : i32, i32
  }
  func.func @transform_4(%arg0: i32) -> (i32, i32) {
    %c0_i32 = arith.constant 0 : i32
    %c0_i32_0 = arith.constant 0 : i32
    %c0_i32_1 = arith.constant 0 : i32
    return %c0_i32, %c0_i32_0 : i32, i32
  }
  func.func @transform_5(%arg0: i32) -> (i32, i32) {
    %c0_i32 = arith.constant 0 : i32
    %c0_i32_0 = arith.constant 0 : i32
    %c0_i32_1 = arith.constant 0 : i32
    return %c0_i32, %c0_i32_0 : i32, i32
  }
  func.func @transform_6(%arg0: i32) -> i32 {
    %c0_i32 = arith.constant 0 : i32
    %c0_i32_0 = arith.constant 0 : i32
    return %c0_i32 : i32
  }
  func.func @transform_7(%arg0: i32) -> (i32, i32) {
    %c0_i32 = arith.constant 0 : i32
    %c0_i32_0 = arith.constant 0 : i32
    return %c0_i32, %arg0 : i32, i32
  }
}

</mosaic_0001>

<bundles_post_ra>
// kernel: tpu_custom_call.1
= control target key start
LH: loop header
LB: loop body
LE: loop exit
PB: predicated region body
PF: predicated region fallthrough
CT: control target
= control target key end

     0   :  { %s1553_s0 = inlined_call_operand.vmem [shape: f32[384,16], index: 0, kind: input, shape index: {}]   ;;  %s1554_s1 = inlined_call_operand.vmem [shape: f32[16,32], index: 1, kind: input, shape index: {}]   ;;  %s1555_s2 = inlined_call_operand.vmem [shape: f32[1,32], index: 2, kind: input, shape index: {}]   ;;  %s1556_s3 = inlined_call_operand.vmem [shape: f32[32,32], index: 3, kind: input, shape index: {}]   ;;  %s1557_s4 = inlined_call_operand.vmem [shape: f32[1,32], index: 4, kind: input, shape index: {}]   ;;  %s1558_s5 = inlined_call_operand.vmem [shape: f32[1,32], index: 5, kind: input, shape index: {}]   ;;  %s1559_s6 = inlined_call_operand.<no memory space> [shape: f32[1], index: 6, kind: input, shape index: {}]   ;;  %s1560_s7 = inlined_call_operand.hbm [shape: f32[1,384], index: 7, kind: output, shape index: {}]  }
   0x1   :  { %12 = sst [smem:[#allocation2]] %s1559_s6 }
   0x2   :  { %13 = vsyncpa [#allocation4], 0 }
   0x3   :  { %15 = vsyncpa [#allocation4 + $0x1], 0  ;;  %s1346_s26 = smov 0   ;;  %s1348_s27 = smov 0  }
   0x4   :  { %s1350_s28 = smov 0   ;;  %s1352_s29 = smov 0  }
   0x5 LB: > { %s933_s6 = sadd.s32 4294967295, %s1297_s29   ;;  %s934_s30 = sadd.s32 4294967294, %s1297_s29   ;;  %s1297_s29 = sphi %s1352_s29, %s1568_s29   ;;  %s1293_s28 = sphi %s1350_s28, %s1567_s28   ;;  %s1289_s27 = sphi %s1348_s27, %s1566_s27   ;;  %s1285_s26 = sphi %s1346_s26, %s1565_s26  }
   0x6   : > { %s1369_s8 = sadd.s32 1, %s1297_s29   ;;  %s180_s9 = sadd.s32 1, %s1293_s28 }
   0x7   : > { %s177_s10 = ssub.s32 %s1297_s29, %s1369_s8  ;;  %p190_p0 = scmp.ne.s32.totalorder %s1293_s28, %s1289_s27 }
   0x8   : > { %p178_p1 = scmp.eq.s32.totalorder %s177_s10, 0  ;;  %p191_p2 = scmp.eq.s32.totalorder %s933_s6, 2 }
   0x9   : > { %p196_p3 = scmp.ne.s32.totalorder %s1289_s27, %s1285_s26  ;;  %p197_p4 = scmp.eq.s32.totalorder %s934_s30, 2 }
   0xa   : > { %s1379_s11 = scalar_select %p178_p1, %s1293_s28, %s180_s9  }
   0xb   : > { %p1381_p5 = por %p191_p2, %p190_p0  ;;  %p1385_p6 = por %p197_p4, %p196_p3 }
   0xc   : > { %p937_p7 = scmp.ge.s32.totalorder %s1297_s29, 1  ;;  %p242_p8 = scmp.lt.s32.totalorder %s1297_s29, 4 }
   0xe   : > { %p243_p9 = pnand %p937_p7, %p242_p8 }
   0xf   : > { %v295_v0 = vld [vmem:[%s1554_s1] sm:$0xff] (!%p243_p9)  ;;  %v296_v1 = vld [vmem:[%s1554_s1 + $0x8] sm:$0xff] (!%p243_p9)  ;;  %s1397_s18 = sshll.u32 (!%p243_p9), %s933_s6, 4  ;;  %v516_v6 = vld [vmem:[%s1556_s3 + $0x10] sm:$0xff] (!%p243_p9)  ;;  %vm304_vm0 = vcmask (!%p243_p9), 130048   ;;  %vm525_vm1 = vcmask (!%p243_p9), 261120  }
  0x10   : > { %246 = sbr.rel (%p243_p9) target bundleno = 783 (0x30f), region = 48  ;;  %v514_v2 = vld [vmem:[%s1556_s3] sm:$0xff] (!%p243_p9)  ;;  %v1145_v3 = vpack.c.bf16 (!%p243_p9), %v296_v1, %v295_v0  ;;  %p274_p10 = scmp.lt.s32.totalorder (!%p243_p9), %s1397_s18, 47  ;;  %v515_v4 = vld [vmem:[%s1556_s3 + $0x8] sm:$0xff] (!%p243_p9)  ;;  %v517_v7 = vld [vmem:[%s1556_s3 + $0x18] sm:$0xff] (!%p243_p9)  ;;  %vm1300_vm2 = vmmov (!%p243_p9), 0  }
  0x11   : > { %v1149_v5 = vpack.c.bf16 (!%p243_p9), %v515_v4, %v514_v2  ;;  %v1153_v11 = vpack.c.bf16 (!%p243_p9), %v517_v7, %v516_v6  ;;  %v940_v25 = vld [vmem:[%s1555_s2] ss:$0 sm:$0xff] (!%p243_p9)  ;;  %vm1475_vm3 = vmpackc.low (!%p243_p9), %vm525_vm1, %vm525_vm1  ;;  %s271_s24 = sand.u32 (!%p243_p9), 1, %s1289_s27   ;;  %s1511_s10 = scalar_lea.hbm (!%p243_p9), %s1560_s7, %s1397_s18 }
  0x12   : > { %1146 = vmatprep.subr.bf16.mxu1 (!%p243_p9), %v1145_v3  ;;  %s272_s25 = scalar_lea.vmem (!%p243_p9), [#allocation3], %s271_s24  ;;  %s867_s14 = scalar_lea.sflag (!%p243_p9), [#allocation4], %s271_s24 }
  0x13   : > { %1148 = vmatpush3.bf16.msra.mxu1 (!%p243_p9), %v1145_v3  ;;  %s879_s6 = sshll.u32 (!%p243_p9), %s272_s25, 4  ;;  %s1302_s16 = smov (!%p243_p9), [#allocation3]   ;;  %s1513_s6 = int_to_ptr.vmem [resolvable:$true] %s879_s6 }
  0x14   : > { %1150 = vmatprep.subr.bf16.mxu1 (!%p243_p9), %v1149_v5  ;;  %s1239_s17 = sshll.u32 (!%p243_p9), %s1302_s16, 4  ;;  %s1240_s17 = int_to_ptr.vmem [resolvable:$false] %s1239_s17 }
  0x15   : > { %s1241_s19 = scalar_lea.vmem (!%p243_p9), %s1240_s17, 32  ;;  %p1242_p0 = scmp.lt.s32.totalorder (!%p243_p9), %s1513_s6, %s1240_s17 }
  0x17   : > { %s275_s23 = scalar_select %p274_p10, %s1397_s18, 47 }
  0x19   : > { %s939_s9 = sshll.u32 %s275_s23, 3  ;;  %s736_s23 = sld [smem:[#allocation2]] }
  0x1a   : > { %s1416_s15 = scalar_lea.vmem %s1553_s0, %s939_s9 }
  0x1b   : > { %v279_v8 = vld [vmem:[%s1416_s15] sm:$0xff]  ;;  %v280_v9 = vld [vmem:[%s1416_s15 + $0x8] sm:$0xff]  ;;  %v281_v10 = vld [vmem:[%s1416_s15 + $0x10] sm:$0xff] }
  0x1c   : > { %1054 = vmatprep.mubr.msk.f32.mxu1 %vm304_vm0, %v279_v8  ;;  %v282_v12 = vld [vmem:[%s1416_s15 + $0x18] sm:$0xff]  ;;  %v283_v13 = vld [vmem:[%s1416_s15 + $0x20] sm:$0xff]  ;;  %v284_v14 = vld [vmem:[%s1416_s15 + $0x28] sm:$0xff] }
  0x1d   : > { %1055 = vmatmul.mubr.msk.f32.vlgmr.msra.gmra.mrb[0].mxu1 %vm304_vm0, %v280_v9  ;;  %v285_v15 = vld [vmem:[%s1416_s15 + $0x30] sm:$0xff]  ;;  %v286_v16 = vld [vmem:[%s1416_s15 + $0x38] sm:$0xff]  ;;  %v287_v17 = vld [vmem:[%s1416_s15 + $0x40] sm:$0xff] }
  0x1e   : > { %1057 = vmatprep.mubr.msk.f32.mxu1 %vm304_vm0, %v281_v10  ;;  %1152 = vmatpush3.bf16.msra.mxu1 %v1149_v5  ;;  %v288_v18 = vld [vmem:[%s1416_s15 + $0x48] sm:$0xff]  ;;  %v289_v19 = vld [vmem:[%s1416_s15 + $0x50] sm:$0xff]  ;;  %v290_v20 = vld [vmem:[%s1416_s15 + $0x58] sm:$0xff]  ;;  %v1299_v10 = vmov 0.0|0.0  }
  0x1f   : > { %1154 = vmatprep.subr.bf16.mxu1 %v1153_v11  ;;  %v291_v21 = vld [vmem:[%s1416_s15 + $0x60] sm:$0xff]  ;;  %v292_v22 = vld [vmem:[%s1416_s15 + $0x68] sm:$0xff]  ;;  %v293_v23 = vld [vmem:[%s1416_s15 + $0x70] sm:$0xff]  ;;  %1157 = vmatprep.subr.bf16.mxu0 %v1299_v10 }
  0x20   : > { %v294_v24 = vld [vmem:[%s1416_s15 + $0x78] sm:$0xff]  ;;  %s1235_s15 = scalar_lea.vmem %s1513_s6, 16 }
  0x21   : > { %1058 = vmatmul.mubr.msk.f32.gmra.mrb[2].mxu1 %vm304_vm0, %v282_v12  ;;  %v957_v12 = vld [vmem:[%s1557_s4] ss:$0 sm:$0xff]  ;;  %p1236_p11 = scmp.ne.s32.totalorder %s1513_s6, %s1235_s15  ;;  %p1243_p1 = scmp.lt.s32.totalorder %s1241_s19, %s1235_s15 }
  0x22   : > { %1060 = vmatprep.mubr.msk.f32.mxu1 %vm304_vm0, %v283_v13  ;;  %1156 = vmatpush3.bf16.msra.mxu1 %v1153_v11  ;;  %v1301_v11 = vmov 0.0  }
  0x23   : > { %1142 = vmatprep.mubr.msk.f32.mxu0 %vm1300_vm2, %v1301_v11  ;;  %p1237_p12 = pnand %p1236_p11, %p1381_p5  ;;  %p1244_p2 = por %p1243_p1, %p1242_p0 }
  0x25   : > { %1061 = vmatmul.mubr.msk.f32.gmra.mrb[4].mxu1 %vm304_vm0, %v284_v14  ;;  %p1238_p13 = pneg %p1237_p12 }
  0x26   : > { %1063 = vmatprep.mubr.msk.f32.mxu1 %vm304_vm0, %v285_v15 }
  0x27   : > { %p1245_p3 = pnand %p1244_p2, %p1238_p13 }
  0x29   : > { %1064 = vmatmul.mubr.msk.f32.gmra.mrb[6].mxu1 %vm304_vm0, %v286_v16 }
  0x2a   : > { %1066 = vmatprep.mubr.msk.f32.mxu1 %vm304_vm0, %v287_v17 }
  0x2d   : > { %1067 = vmatmul.mubr.msk.f32.gmra.mrb[8].mxu1 %vm304_vm0, %v288_v18 }
  0x2e   : > { %1069 = vmatprep.mubr.msk.f32.mxu1 %vm304_vm0, %v289_v19 }
  0x31   : > { %1070 = vmatmul.mubr.msk.f32.gmra.mrb[10].mxu1 %vm304_vm0, %v290_v20 }
  0x32   : > { %1072 = vmatprep.mubr.msk.f32.mxu1 %vm304_vm0, %v291_v21 }
  0x35   : > { %1073 = vmatmul.mubr.msk.f32.gmra.mrb[12].mxu1 %vm304_vm0, %v292_v22 }
  0x36   : > { %1075 = vmatprep.mubr.msk.f32.mxu1 %vm304_vm0, %v293_v23 }
  0x39   : > { %1076 = vmatmul.mubr.msk.f32.gmra.mrb[14].mxu1 %vm304_vm0, %v294_v24 }
  0xf0   : > { %v1056_v26 = vpop.f32.mrb[0].mxu1 }
  0xf1   : > { %v425_v27 = vadd.f32 %v1056_v26, %v940_v25  ;;  %v419_v28 = vpop.f32.mrb[1].mxu1 }
  0xf2   : > { %v420_v29 = vadd.f32 %v940_v25, %v419_v28 }
  0xf3   : > { %v499_v32 = vmax.f32 %v425_v27, 0.0 }
  0xf4   : > { %v498_v30 = vmax.f32 %v420_v29, 0.0  ;;  %v1059_v31 = vpop.f32.mrb[2].mxu1 }
  0xf5   : > { %v435_v33 = vadd.f32 %v1059_v31, %v940_v25  ;;  %v429_v34 = vpop.f32.mrb[3].mxu1 }
  0xf6   : > { %v430_v35 = vadd.f32 %v940_v25, %v429_v34  ;;  %1086 = vmatprep.mubr.msk.f32.mxu1 %vm525_vm1, %v498_v30 }
  0xf7   : > { %v501_v36 = vmax.f32 %v435_v33, 0.0  ;;  %1087 = vmatmul.mubr.msk.f32.vlgmr.msra.gmra.mrb[16].mxu1 %vm525_vm1, %v499_v32 }
  0xf8   : > { %v500_v37 = vmax.f32 %v430_v35, 0.0  ;;  %v1062_v38 = vpop.f32.mrb[4].mxu1 }
  0xf9   : > { %v445_v39 = vadd.f32 %v1062_v38, %v940_v25  ;;  %v439_v40 = vpop.f32.mrb[5].mxu1 }
  0xfa   : > { %1089 = vmatprep.mubr.msk.f32.mxu1 %vm525_vm1, %v500_v37  ;;  %v440_v41 = vadd.f32 %v940_v25, %v439_v40 }
  0xfb   : > { %1090 = vmatmul.mubr.msk.f32.gmra.mrb[18].mxu1 %vm525_vm1, %v501_v36  ;;  %v503_v42 = vmax.f32 %v445_v39, 0.0 }
  0xfc   : > { %v502_v43 = vmax.f32 %v440_v41, 0.0  ;;  %v1065_v44 = vpop.f32.mrb[6].mxu1 }
  0xfd   : > { %v455_v45 = vadd.f32 %v1065_v44, %v940_v25  ;;  %v449_v46 = vpop.f32.mrb[7].mxu1 }
  0xfe   : > { %1092 = vmatprep.mubr.msk.f32.mxu1 %vm525_vm1, %v502_v43  ;;  %v450_v47 = vadd.f32 %v940_v25, %v449_v46 }
  0xff   : > { %1093 = vmatmul.mubr.msk.f32.gmra.mrb[20].mxu1 %vm525_vm1, %v503_v42  ;;  %v505_v48 = vmax.f32 %v455_v45, 0.0 }
 0x100   : > { %v504_v49 = vmax.f32 %v450_v47, 0.0  ;;  %v1068_v50 = vpop.f32.mrb[8].mxu1 }
 0x101   : > { %v465_v51 = vadd.f32 %v1068_v50, %v940_v25  ;;  %v459_v52 = vpop.f32.mrb[9].mxu1 }
 0x102   : > { %1095 = vmatprep.mubr.msk.f32.mxu1 %vm525_vm1, %v504_v49  ;;  %v460_v53 = vadd.f32 %v940_v25, %v459_v52 }
 0x103   : > { %1096 = vmatmul.mubr.msk.f32.gmra.mrb[22].mxu1 %vm525_vm1, %v505_v48  ;;  %v507_v54 = vmax.f32 %v465_v51, 0.0 }
 0x104   : > { %v506_v55 = vmax.f32 %v460_v53, 0.0  ;;  %v1071_v56 = vpop.f32.mrb[10].mxu1 }
 0x105   : > { %v475_v57 = vadd.f32 %v1071_v56, %v940_v25  ;;  %v469_v58 = vpop.f32.mrb[11].mxu1 }
 0x106   : > { %1098 = vmatprep.mubr.msk.f32.mxu1 %vm525_vm1, %v506_v55  ;;  %v470_v59 = vadd.f32 %v940_v25, %v469_v58 }
 0x107   : > { %1099 = vmatmul.mubr.msk.f32.gmra.mrb[24].mxu1 %vm525_vm1, %v507_v54  ;;  %v509_v60 = vmax.f32 %v475_v57, 0.0 }
 0x108   : > { %v508_v61 = vmax.f32 %v470_v59, 0.0  ;;  %v1074_v62 = vpop.f32.mrb[12].mxu1 }
 0x109   : > { %v485_v63 = vadd.f32 %v1074_v62, %v940_v25  ;;  %v479_v0 = vpop.f32.mrb[13].mxu1 }
 0x10a   : > { %1101 = vmatprep.mubr.msk.f32.mxu1 %vm525_vm1, %v508_v61  ;;  %v480_v1 = vadd.f32 %v940_v25, %v479_v0 }
 0x10b   : > { %1102 = vmatmul.mubr.msk.f32.gmra.mrb[26].mxu1 %vm525_vm1, %v509_v60  ;;  %v511_v2 = vmax.f32 %v485_v63, 0.0 }
 0x10c   : > { %v510_v3 = vmax.f32 %v480_v1, 0.0  ;;  %v1077_v4 = vpop.f32.mrb[14].mxu1 }
 0x10d   : > { %v495_v5 = vadd.f32 %v1077_v4, %v940_v25  ;;  %v489_v6 = vpop.f32.mrb[15].mxu1 }
 0x10e   : > { %1104 = vmatprep.mubr.msk.f32.mxu1 %vm525_vm1, %v510_v3  ;;  %v490_v7 = vadd.f32 %v940_v25, %v489_v6  ;;  %v735_v6 = vld [vmem:[%s1558_s5] sm:$0x1] }
 0x10f   : > { %1105 = vmatmul.mubr.msk.f32.gmra.mrb[28].mxu1 %vm525_vm1, %v511_v2  ;;  %v513_v8 = vmax.f32 %v495_v5, 0.0 }
 0x110   : > { %v512_v9 = vmax.f32 %v490_v7, 0.0  ;;  %v737_v7 = vstv %s736_s23 }
 0x112   : > { %1107 = vmatprep.mubr.msk.f32.mxu1 %vm525_vm1, %v512_v9 }
 0x113   : > { %1108 = vmatmul.mubr.msk.f32.gmra.mrb[30].mxu1 %vm525_vm1, %v513_v8 }
 0x1ca   : > { %v1088_v13 = vpop.f32.mrb[16].mxu1 }
 0x1cb   : > { %v646_v14 = vadd.f32 %v1088_v13, %v957_v12  ;;  %v640_v15 = vpop.f32.mrb[17].mxu1 }
 0x1cc   : > { %v641_v16 = vadd.f32 %v957_v12, %v640_v15 }
 0x1cd   : > { %v720_v17 = vmax.f32 %v646_v14, 0.0 }
 0x1ce   : > { %v719_v18 = vmax.f32 %v641_v16, 0.0  ;;  %v1091_v19 = vpop.f32.mrb[18].mxu1 }
 0x1cf   : > { %v656_v20 = vadd.f32 %v1091_v19, %v957_v12  ;;  %v650_v21 = vpop.f32.mrb[19].mxu1 }
 0x1d0   : > { %v1158_v23 = vpack.c.bf16 %v720_v17, %v719_v18  ;;  %v651_v24 = vadd.f32 %v957_v12, %v650_v21 }
 0x1d1   : > { %v722_v25 = vmax.f32 %v656_v20, 0.0 }
 0x1d2   : > { %v721_v26 = vmax.f32 %v651_v24, 0.0  ;;  %1160 = vmatpush3.bf16.xpose.msk.msra.mxu0 %vm1475_vm3, %v1158_v23  ;;  %v1094_v27 = vpop.f32.mrb[20].mxu1 }
 0x1d3   : > { %v666_v28 = vadd.f32 %v1094_v27, %v957_v12  ;;  %v660_v29 = vpop.f32.mrb[21].mxu1  ;;  %1161 = vmatprep.subr.bf16.mxu0 %v1299_v10 }
 0x1d4   : > { %v1162_v30 = vpack.c.bf16 %v722_v25, %v721_v26  ;;  %v661_v31 = vadd.f32 %v957_v12, %v660_v29 }
 0x1d5   : > { %v724_v32 = vmax.f32 %v666_v28, 0.0 }
 0x1d6   : > { %v723_v33 = vmax.f32 %v661_v31, 0.0  ;;  %v1097_v34 = vpop.f32.mrb[22].mxu1 }
 0x1d7   : > { %v676_v35 = vadd.f32 %v1097_v34, %v957_v12  ;;  %v670_v36 = vpop.f32.mrb[23].mxu1 }
 0x1d8   : > { %v1166_v37 = vpack.c.bf16 %v724_v32, %v723_v33  ;;  %v671_v38 = vadd.f32 %v957_v12, %v670_v36 }
 0x1d9   : > { %v726_v39 = vmax.f32 %v676_v35, 0.0 }
 0x1da   : > { %1164 = vmatpush3.bf16.xpose.msk.msra.mxu0 %vm1475_vm3, %v1162_v30  ;;  %v725_v40 = vmax.f32 %v671_v38, 0.0  ;;  %v1100_v41 = vpop.f32.mrb[24].mxu1 }
 0x1db   : > { %1165 = vmatprep.subr.bf16.mxu0 %v1299_v10  ;;  %v686_v42 = vadd.f32 %v1100_v41, %v957_v12  ;;  %v680_v43 = vpop.f32.mrb[25].mxu1 }
 0x1dc   : > { %v1170_v44 = vpack.c.bf16 %v726_v39, %v725_v40  ;;  %v681_v45 = vadd.f32 %v957_v12, %v680_v43 }
 0x1dd   : > { %v728_v46 = vmax.f32 %v686_v42, 0.0 }
 0x1de   : > { %v727_v47 = vmax.f32 %v681_v45, 0.0  ;;  %v1103_v48 = vpop.f32.mrb[26].mxu1 }
 0x1df   : > { %v696_v49 = vadd.f32 %v1103_v48, %v957_v12  ;;  %v690_v50 = vpop.f32.mrb[27].mxu1 }
 0x1e0   : > { %v1174_v51 = vpack.c.bf16 %v728_v46, %v727_v47  ;;  %v691_v52 = vadd.f32 %v957_v12, %v690_v50 }
 0x1e1   : > { %v730_v53 = vmax.f32 %v696_v49, 0.0 }
 0x1e2   : > { %1168 = vmatpush3.bf16.xpose.msk.msra.mxu0 %vm1475_vm3, %v1166_v37  ;;  %v729_v54 = vmax.f32 %v691_v52, 0.0  ;;  %v1106_v55 = vpop.f32.mrb[28].mxu1 }
 0x1e3   : > { %1169 = vmatprep.subr.bf16.mxu0 %v1299_v10  ;;  %v706_v56 = vadd.f32 %v1106_v55, %v957_v12  ;;  %v700_v57 = vpop.f32.mrb[29].mxu1 }
 0x1e4   : > { %v1178_v58 = vpack.c.bf16 %v730_v53, %v729_v54  ;;  %v701_v59 = vadd.f32 %v957_v12, %v700_v57 }
 0x1e5   : > { %v732_v60 = vmax.f32 %v706_v56, 0.0 }
 0x1e6   : > { %v731_v61 = vmax.f32 %v701_v59, 0.0  ;;  %v1109_v62 = vpop.f32.mrb[30].mxu1 }
 0x1e7   : > { %v716_v63 = vadd.f32 %v1109_v62, %v957_v12  ;;  %v710_v0 = vpop.f32.mrb[31].mxu1 }
 0x1e8   : > { %v1182_v1 = vpack.c.bf16 %v732_v60, %v731_v61  ;;  %v711_v2 = vadd.f32 %v957_v12, %v710_v0 }
 0x1e9   : > { %v734_v3 = vmax.f32 %v716_v63, 0.0 }
 0x1ea   : > { %1172 = vmatpush3.bf16.xpose.msk.msra.mxu0 %vm1475_vm3, %v1170_v44  ;;  %v733_v4 = vmax.f32 %v711_v2, 0.0 }
 0x1eb   : > { %1173 = vmatprep.subr.bf16.mxu0 %v1299_v10 }
 0x1ec   : > { %v1186_v5 = vpack.c.bf16 %v734_v3, %v733_v4 }
 0x1f2   : > { %1176 = vmatpush3.bf16.xpose.msk.msra.mxu0 %vm1475_vm3, %v1174_v51 }
 0x1f3   : > { %1177 = vmatprep.subr.bf16.mxu0 %v1299_v10 }
 0x1fa   : > { %1180 = vmatpush3.bf16.xpose.msk.msra.mxu0 %vm1475_vm3, %v1178_v58 }
 0x1fb   : > { %1181 = vmatprep.subr.bf16.mxu0 %v1299_v10 }
 0x202   : > { %1184 = vmatpush3.bf16.xpose.msk.msra.mxu0 %vm1475_vm3, %v1182_v1 }
 0x203   : > { %1185 = vmatprep.subr.bf16.mxu0 %v1299_v10 }
 0x20a   : > { %1188 = vmatpush3.bf16.xpose.msk.msra.mxu0 %vm1475_vm3, %v1186_v5 }
 0x211   : > { %1143 = vmatmul.mubr.msk.f32.vlgmr.msra.gmra.mrb[0].mxu0 %vm525_vm1, %v735_v6 }
 0x2e4   : > { %v855_v8 = vpop.f32.mrb[0].mxu0 }
 0x2e5   : > { %v856_v9 = vadd.f32 %v855_v8, %v737_v7  ;;  %v1144_v11 = vpop.f32.mrb[1].mxu0 }
 0x2e7   : > { %v991_v12 = vmul.f32 -1.442695, %v856_v9 }
 0x2e9   : > { %1231 = vpow2.f32 %v991_v12 }
 0x2f3   : > { %v1232_v13 = vpop.eup %1231 }
 0x2f4   : > { %v862_v10 = vadd.f32 1.0, %v1232_v13 }
 0x2f6   : > { %1233 = vrcp.f32 %v862_v10 }
 0x300   : > { %v1234_v14 = vpop.eup %1233 }
 0x301   : > { %865 = vst [vmem:[%s272_s25] sm:$0x1] %v1234_v14 }
 0x302   : > { %1248 = shalt.err (!%p1245_p3)
}
 0x303   : > { %s1249_s18 = scalar_lea.hbm %s1511_s10, 16  ;;  %s1253_s22 = scalar_lea.hbm %s1560_s7, 48 }
 0x304   : > { %p1250_p4 = scmp.ne.s32.totalorder %s1511_s10, %s1249_s18  ;;  %p1254_p9 = scmp.lt.u32.totalorder %s1511_s10, %s1560_s7 }
 0x305   : > { %p1255_p10 = scmp.lt.u32.totalorder %s1253_s22, %s1249_s18  ;;  %p1257_p12 = scmp.lt.u32.totalorder %s1249_s18, %s1511_s10 }
 0x306   : > { %p1251_p7 = pnand %p1250_p4, %p1381_p5 }
 0x307   : > { %p1256_p11 = por %p1255_p10, %p1254_p9 }
 0x308   : > { %p1252_p8 = pneg %p1251_p7 }
 0x309   : > { %p1258_p13 = por %p1257_p12, %p1256_p11 }
 0x30b   : > { %p1259_p0 = pnand %p1258_p13, %p1252_p8 }
 0x30d   : > { %1262 = shalt.err (!%p1259_p0)
}
 0x30e   : > { %1189 = dma.vmem_to_hbm [thread:$0]  (%p1381_p5), %s1513_s6, 16, %s1511_s10, %s867_s14  }
 0x30f PF: > { %p1195_p1 = scmp.ge.s32.totalorder %s1297_s29, 2  ;;  %s891_s25 = sand.u32 1, %s1285_s26  }
 0x310   : > { %s892_s30 = scalar_lea.sflag [#allocation4], %s891_s25 }
 0x311   : > { %p1192_p2 = pnand %p1195_p1, %p1385_p6 }
 0x313   : > { %1280 = dma.done.wait (!%p1192_p2), %s892_s30, 16  }
 0x314   : > { %1282 = vsyncadd (!%p1192_p2), %s892_s30, 4294967280  ;;  %p18_p3 = scmp.ge.s32.totalorder %s1369_s8, 5   ;;  %s1565_s26 = smov %s1289_s27 }
 0x315   : > { %s1566_s27 = smov %s1293_s28  ;;  %s1567_s28 = smov %s1379_s11 }
 0x316   : > { %s1568_s29 = smov %s1369_s8  ;;  %20 = sbr.rel (!%p18_p3) target bundleno = 5 (0x5), region = 83 }
 0x31d   :  { %896 = vsyncpa [#allocation4], 1 }
 0x31e   :  { %898 = vsyncpa [#allocation4 + $0x1], 1 }

</bundles_post_ra>
